<compile_context>
chip_gen: v7x
topology: tpu7x:2x2x1
jax: 0.10.0
libtpu: 0.0.40
codegen_flags: <defaults>
</compile_context>

<pallas_src>
import functools

import jax
import jax.numpy as jnp
from jax.experimental import pallas as pl
from jax.experimental.pallas import tpu as pltpu

_EPS = 1e-5  # PyTorch BatchNorm1d default eps


def _round_up(n, m):
    return ((n + m - 1) // m) * m


def _fraud_mlp_kernel(xt_ref, w1_ref, w2_ref, w3_ref, misc_ref, o_ref):
    """One batch tile.

    xt_ref : (din, TM) bf16 input tile (batch on the lane axis)
    wN_ref : (dout, din) bf16 BN-folded weights (VMEM-resident)
    misc_ref: (128, 8) f32 packed columns [b1 | b2 | b3 | b4 | w4_head | 0 | 0 | 0]
    o_ref  : (1, TM) f32 sigmoid probabilities (lane-dense)
    """
    # Packed per-feature vectors (static column slices; broadcast along lanes).
    b1 = misc_ref[:, 0:1]      # (128, 1)
    b2 = misc_ref[:64, 1:2]    # (64, 1)
    b3 = misc_ref[:32, 2:3]    # (32, 1)
    b4 = misc_ref[0:1, 3:4]    # (1, 1)
    w4 = misc_ref[:32, 4:5]    # (32, 1) head weight

    xt = xt_ref[...]           # (din, TM) bf16

    # Layer 1 (+folded BN) + ReLU : (128, din) @ (din, TM)   [Dropout == identity in eval]
    h = jnp.dot(w1_ref[...], xt, preferred_element_type=jnp.float32)
    h = jnp.maximum(h + b1, 0.0)

    # Layer 2 (+folded BN) + ReLU : (64, 128) @ (128, TM)
    h = jnp.dot(w2_ref[...], h.astype(jnp.bfloat16), preferred_element_type=jnp.float32)
    h = jnp.maximum(h + b2, 0.0)

    # Layer 3 (+folded BN) + ReLU : (32, 64) @ (64, TM)
    h = jnp.dot(w3_ref[...], h.astype(jnp.bfloat16), preferred_element_type=jnp.float32)
    h = jnp.maximum(h + b3, 0.0)

    # Head Linear(32, 1): broadcast-multiply + sublane reduction -> (1, TM) lane-dense.
    logits = jnp.sum(h * w4, axis=0, keepdims=True) + b4
    # sigmoid: exp on the EUP; reciprocal via approx vrcp (also EUP slot).
    o_ref[...] = pl.reciprocal(1.0 + jnp.exp(-logits), approx=True)


def _fold_bn(w, b, g, be, m, v):
    """Fold eval-mode BatchNorm1d into the preceding Linear. w:(din,dout), rest:(1,dout)."""
    scale = g * jax.lax.rsqrt(v + _EPS)
    return w * scale, (b - m) * scale + be


def fraud_detection_forward(x, params, *, block_batch=1024):
    """x: (N, input_dim) float32. params: flat tuple (see init_params). Returns (N, 1) f32."""
    (w1, b1, g1, be1, m1, v1,
     w2, b2, g2, be2, m2, v2,
     w3, b3, g3, be3, m3, v3,
     w4, b4) = params

    w1f, b1f = _fold_bn(w1, b1, g1, be1, m1, v1)
    w2f, b2f = _fold_bn(w2, b2, g2, be2, m2, v2)
    w3f, b3f = _fold_bn(w3, b3, g3, be3, m3, v3)

    # Feature-major (transposed) bf16 weights for the MXU.
    w1t = w1f.T.astype(jnp.bfloat16)   # (128, din)
    w2t = w2f.T.astype(jnp.bfloat16)   # (64, 128)
    w3t = w3f.T.astype(jnp.bfloat16)   # (32, 64)

    # Pack the four biases and the head weight into one (128, 8) f32 operand.
    misc = jnp.zeros((128, 8), jnp.float32)
    misc = misc.at[:, 0].set(b1f[0])
    misc = misc.at[:64, 1].set(b2f[0])
    misc = misc.at[:32, 2].set(b3f[0])
    misc = misc.at[0, 3].set(b4[0, 0])
    misc = misc.at[:32, 4].set(w4[:, 0])

    n, d = x.shape
    tm = max(128, min(_round_up(block_batch, 128), _round_up(n, 128)))
    n_pad = _round_up(n, tm)
    x_pad = jnp.pad(x, ((0, n_pad - n), (0, 0)))
    xt = x_pad.T.astype(jnp.bfloat16)          # (din, n_pad): batch on the lane axis

    out = pl.pallas_call(
        _fraud_mlp_kernel,
        out_shape=jax.ShapeDtypeStruct((1, n_pad), jnp.float32),
        grid=(n_pad // tm,),
        in_specs=[
            pl.BlockSpec((d, tm), lambda i: (0, i)),      # x tile: streamed per grid step
            pl.BlockSpec((128, d), lambda i: (0, 0)),     # weights: VMEM-resident
            pl.BlockSpec((64, 128), lambda i: (0, 0)),
            pl.BlockSpec((32, 64), lambda i: (0, 0)),
            pl.BlockSpec((128, 8), lambda i: (0, 0)),     # packed biases + head weight
        ],
        out_specs=pl.BlockSpec((1, tm), lambda i: (0, i)),  # lane-dense output slab
        compiler_params=pltpu.CompilerParams(dimension_semantics=("parallel",)),
    )(xt, w1t, w2t, w3t, misc)

    return out[0, :n].reshape(n, 1)


def init_params(key, input_dim):
    """Deterministic synthetic parameters matching the nn.Module shapes."""
    dims = [(input_dim, 128), (128, 64), (64, 32), (32, 1)]
    keys = jax.random.split(key, 16)
    ki = iter(range(16))
    params = []
    for li, (din, dout) in enumerate(dims):
        w = jax.random.normal(keys[next(ki)], (din, dout), jnp.float32) * 0.1
        b = jax.random.normal(keys[next(ki)], (1, dout), jnp.float32) * 0.05
        params += [w, b]
        if li < 3:  # BatchNorm1d after the first three linears
            g = 1.0 + 0.1 * jax.random.normal(keys[next(ki)], (1, dout), jnp.float32)
            be = 0.05 * jax.random.normal(keys[next(ki)], (1, dout), jnp.float32)
            m = 0.02 * jnp.arange(dout, dtype=jnp.float32).reshape(1, dout)
            v = 1.0 + 0.01 * jnp.arange(dout, dtype=jnp.float32).reshape(1, dout)
            params += [g, be, m, v]
    return tuple(params)


def _reference_forward(x, params):
    """Plain-JAX f32 reference (PyTorch semantics, unfolded BN) for correctness checking."""
    p = list(params)
    h = x
    idx = 0
    for li in range(4):
        w, b = p[idx], p[idx + 1]
        idx += 2
        h = h @ w + b
        if li < 3:
            g, be, m, v = p[idx], p[idx + 1], p[idx + 2], p[idx + 3]
            idx += 4
            h = (h - m) / jnp.sqrt(v + _EPS) * g + be
            h = jnp.maximum(h, 0.0)
            # TODO(synk): Dropout(0.3) skipped — identity at inference time.
    return 1.0 / (1.0 + jnp.exp(-h))


if __name__ == "__main__":
    key = jax.random.PRNGKey(0)
    k_x, k_p = jax.random.split(key)

    batch, input_dim = 256, 30
    x = jax.random.normal(k_x, (batch, input_dim), jnp.float32)
    params = init_params(k_p, input_dim)

    # Small block so the test exercises a multi-step batch grid (grid=(2,)).
    fwd = jax.jit(functools.partial(fraud_detection_forward, block_batch=128))
    out = jax.block_until_ready(fwd(x, params))

    ref = _reference_forward(x, params)
    assert out.shape == (batch, 1), out.shape
    max_err = float(jnp.max(jnp.abs(out - ref)))
    # bf16 MXU inputs + approx reciprocal => small deviation from the f32 reference.
    assert max_err < 2e-2, f"mismatch vs reference: max_err={max_err}"

    print("KERNEL_OK")
</pallas_src>

<mosaic_0001>
module attributes {stable_mosaic.version = 11 : i64} {
  func.func @_fraud_mlp_kernel(%arg0: i32, %arg1: memref<30x128xbf16, #tpu.memory_space<vmem>>, %arg2: memref<128x30xbf16, #tpu.memory_space<vmem>>, %arg3: memref<64x128xbf16, #tpu.memory_space<vmem>>, %arg4: memref<32x64xbf16, #tpu.memory_space<vmem>>, %arg5: memref<128x8xf32, #tpu.memory_space<vmem>>, %arg6: memref<1x128xf32, #tpu.memory_space<vmem>>) attributes {dimension_semantics = [#tpu.dimension_semantics<parallel>], iteration_bounds = array<i64: 2>, scalar_prefetch = 0 : i64, scratch_operands = 0 : i64, tpu.core_type = #tpu.core_type<tc>, window_params = [{transform_indices = @transform_0, window_bounds = array<i64: 30, 128>}, {pipeline_mode = #tpu.pipeline_mode<synchronous>, transform_indices = @transform_1, window_bounds = array<i64: 128, 30>}, {pipeline_mode = #tpu.pipeline_mode<synchronous>, transform_indices = @transform_2, window_bounds = array<i64: 64, 128>}, {pipeline_mode = #tpu.pipeline_mode<synchronous>, transform_indices = @transform_3, window_bounds = array<i64: 32, 64>}, {pipeline_mode = #tpu.pipeline_mode<synchronous>, transform_indices = @transform_4, window_bounds = array<i64: 128, 8>}, {transform_indices = @transform_5, window_bounds = array<i64: 1, 128>}]} {
    %c0 = arith.constant 0 : index
    %c0_0 = arith.constant 0 : index
    %0 = vector.load %arg5[%c0, %c0_0] : memref<128x8xf32, #tpu.memory_space<vmem>>, vector<128x1xf32>
    %c0_1 = arith.constant 0 : index
    %c1 = arith.constant 1 : index
    %1 = vector.load %arg5[%c0_1, %c1] : memref<128x8xf32, #tpu.memory_space<vmem>>, vector<64x1xf32>
    %c0_2 = arith.constant 0 : index
    %c2 = arith.constant 2 : index
    %2 = vector.load %arg5[%c0_2, %c2] : memref<128x8xf32, #tpu.memory_space<vmem>>, vector<32x1xf32>
    %c0_3 = arith.constant 0 : index
    %c3 = arith.constant 3 : index
    %3 = vector.load %arg5[%c0_3, %c3] : memref<128x8xf32, #tpu.memory_space<vmem>>, vector<1x1xf32>
    %c0_4 = arith.constant 0 : index
    %c4 = arith.constant 4 : index
    %4 = vector.load %arg5[%c0_4, %c4] : memref<128x8xf32, #tpu.memory_space<vmem>>, vector<32x1xf32>
    %c0_5 = arith.constant 0 : index
    %c0_6 = arith.constant 0 : index
    %5 = vector.load %arg1[%c0_5, %c0_6] : memref<30x128xbf16, #tpu.memory_space<vmem>>, vector<30x128xbf16>
    %c0_7 = arith.constant 0 : index
    %c0_8 = arith.constant 0 : index
    %6 = vector.load %arg2[%c0_7, %c0_8] : memref<128x30xbf16, #tpu.memory_space<vmem>>, vector<128x30xbf16>
    %cst = arith.constant dense<0.000000e+00> : vector<128x128xf32>
    %7 = tpu.matmul %6, %5, %cst {dimension_numbers = #tpu.dot_dimension_numbers<[1], [0], [0], [1], [0, 0, 1, 1], [], []>} : vector<128x30xbf16>, vector<30x128xbf16>, vector<128x128xf32> -> vector<128x128xf32>
    %8 = vector.broadcast %0 : vector<128x1xf32> to vector<128x128xf32>
    %9 = arith.addf %7, %8 : vector<128x128xf32>
    %cst_9 = arith.constant 0.000000e+00 : f32
    %10 = vector.broadcast %cst_9 : f32 to vector<128x128xf32>
    %11 = arith.maximumf %9, %10 : vector<128x128xf32>
    %c0_10 = arith.constant 0 : index
    %c0_11 = arith.constant 0 : index
    %12 = vector.load %arg3[%c0_10, %c0_11] : memref<64x128xbf16, #tpu.memory_space<vmem>>, vector<64x128xbf16>
    %13 = arith.truncf %11 : vector<128x128xf32> to vector<128x128xbf16>
    %cst_12 = arith.constant dense<0.000000e+00> : vector<64x128xf32>
    %14 = tpu.matmul %12, %13, %cst_12 {dimension_numbers = #tpu.dot_dimension_numbers<[1], [0], [0], [1], [0, 0, 1, 1], [], []>} : vector<64x128xbf16>, vector<128x128xbf16>, vector<64x128xf32> -> vector<64x128xf32>
    %15 = vector.broadcast %1 : vector<64x1xf32> to vector<64x128xf32>
    %16 = arith.addf %14, %15 : vector<64x128xf32>
    %cst_13 = arith.constant 0.000000e+00 : f32
    %17 = vector.broadcast %cst_13 : f32 to vector<64x128xf32>
    %18 = arith.maximumf %16, %17 : vector<64x128xf32>
    %c0_14 = arith.constant 0 : index
    %c0_15 = arith.constant 0 : index
    %19 = vector.load %arg4[%c0_14, %c0_15] : memref<32x64xbf16, #tpu.memory_space<vmem>>, vector<32x64xbf16>
    %20 = arith.truncf %18 : vector<64x128xf32> to vector<64x128xbf16>
    %cst_16 = arith.constant dense<0.000000e+00> : vector<32x128xf32>
    %21 = tpu.matmul %19, %20, %cst_16 {dimension_numbers = #tpu.dot_dimension_numbers<[1], [0], [0], [1], [0, 0, 1, 1], [], []>} : vector<32x64xbf16>, vector<64x128xbf16>, vector<32x128xf32> -> vector<32x128xf32>
    %22 = vector.broadcast %2 : vector<32x1xf32> to vector<32x128xf32>
    %23 = arith.addf %21, %22 : vector<32x128xf32>
    %cst_17 = arith.constant 0.000000e+00 : f32
    %24 = vector.broadcast %cst_17 : f32 to vector<32x128xf32>
    %25 = arith.maximumf %23, %24 : vector<32x128xf32>
    %26 = vector.broadcast %4 : vector<32x1xf32> to vector<32x128xf32>
    %27 = arith.mulf %25, %26 : vector<32x128xf32>
    %cst_18 = arith.constant dense<0.000000e+00> : vector<128xf32>
    %28 = vector.multi_reduction <add>, %27, %cst_18 [0] : vector<32x128xf32> to vector<128xf32>
    %29 = vector.shape_cast %28 : vector<128xf32> to vector<1x128xf32>
    %30 = vector.broadcast %3 : vector<1x1xf32> to vector<1x128xf32>
    %31 = arith.addf %29, %30 : vector<1x128xf32>
    %cst_19 = arith.constant 0.000000e+00 : f32
    %32 = vector.broadcast %cst_19 : f32 to vector<1x128xf32>
    %33 = arith.subf %32, %31 : vector<1x128xf32>
    %34 = math.exp %33 : vector<1x128xf32>
    %cst_20 = arith.constant 1.000000e+00 : f32
    %35 = vector.broadcast %cst_20 : f32 to vector<1x128xf32>
    %36 = arith.addf %35, %34 : vector<1x128xf32>
    %37 = tpu.reciprocal %36 {approx = true} : vector<1x128xf32> -> vector<1x128xf32>
    %c0_21 = arith.constant 0 : index
    %c0_22 = arith.constant 0 : index
    %38 = vector.load %arg6[%c0_21, %c0_22] : memref<1x128xf32, #tpu.memory_space<vmem>>, vector<1x128xf32>
    tpu.vector_store %arg6[%c0_21, %c0_22], %37 {strides = array<i32>} : memref<1x128xf32, #tpu.memory_space<vmem>>, vector<1x128xf32>,
    return
  }
  func.func @transform_0(%arg0: i32) -> (i32, i32) {
    %c0_i32 = arith.constant 0 : i32
    %c0_i32_0 = arith.constant 0 : i32
    return %c0_i32, %arg0 : i32, i32
  }
  func.func @transform_1(%arg0: i32) -> (i32, i32) {
    %c0_i32 = arith.constant 0 : i32
    %c0_i32_0 = arith.constant 0 : i32
    %c0_i32_1 = arith.constant 0 : i32
    return %c0_i32, %c0_i32_0 : i32, i32
  }
  func.func @transform_2(%arg0: i32) -> (i32, i32) {
    %c0_i32 = arith.constant 0 : i32
    %c0_i32_0 = arith.constant 0 : i32
    %c0_i32_1 = arith.constant 0 : i32
    return %c0_i32, %c0_i32_0 : i32, i32
  }
  func.func @transform_3(%arg0: i32) -> (i32, i32) {
    %c0_i32 = arith.constant 0 : i32
    %c0_i32_0 = arith.constant 0 : i32
    %c0_i32_1 = arith.constant 0 : i32
    return %c0_i32, %c0_i32_0 : i32, i32
  }
  func.func @transform_4(%arg0: i32) -> (i32, i32) {
    %c0_i32 = arith.constant 0 : i32
    %c0_i32_0 = arith.constant 0 : i32
    %c0_i32_1 = arith.constant 0 : i32
    return %c0_i32, %c0_i32_0 : i32, i32
  }
  func.func @transform_5(%arg0: i32) -> (i32, i32) {
    %c0_i32 = arith.constant 0 : i32
    %c0_i32_0 = arith.constant 0 : i32
    return %c0_i32, %arg0 : i32, i32
  }
}

</mosaic_0001>

<bundles_post_ra>
// kernel: fraud_detection_forward.1
= control target key start
LH: loop header
LB: loop body
LE: loop exit
PB: predicated region body
PF: predicated region fallthrough
CT: control target
= control target key end

     0   :  { %10 = vsyncpa [#allocation4], 0  ;;  %s1472_s0 = inlined_call_operand.vmem [shape: bf16[30,256], index: 0, kind: input, shape index: {}]   ;;  %s1473_s1 = inlined_call_operand.vmem [shape: bf16[128,30], index: 1, kind: input, shape index: {}]   ;;  %s1474_s2 = inlined_call_operand.vmem [shape: bf16[64,128], index: 2, kind: input, shape index: {}]   ;;  %s1475_s3 = inlined_call_operand.vmem [shape: bf16[32,64], index: 3, kind: input, shape index: {}]   ;;  %s1476_s4 = inlined_call_operand.vmem [shape: f32[128,8], index: 4, kind: input, shape index: {}]   ;;  %s1477_s5 = inlined_call_operand.hbm [shape: f32[1,256], index: 5, kind: output, shape index: {}]  }
   0x1   :  { %12 = vsyncpa [#allocation4 + $0x1], 0  ;;  %s1235_s18 = smov 0   ;;  %s1237_s19 = smov 0  }
   0x2   :  { %s1239_s20 = smov 0   ;;  %s1241_s21 = smov 0  }
   0x3 LB: > { %s939_s22 = sadd.s32 4294967295, %s1197_s21   ;;  %s940_s23 = sadd.s32 4294967294, %s1197_s21   ;;  %s1197_s21 = sphi %s1241_s21, %s1483_s21   ;;  %s1193_s20 = sphi %s1239_s20, %s1482_s20   ;;  %s1189_s19 = sphi %s1237_s19, %s1481_s19   ;;  %s1185_s18 = sphi %s1235_s18, %s1480_s18  }
   0x4   : > { %s1258_s24 = sadd.s32 1, %s1197_s21   ;;  %s25_s25 = sadd.s32 1, %s1193_s20 }
   0x5   : > { %s22_s26 = ssub.s32 %s1197_s21, %s1258_s24  ;;  %p32_p0 = scmp.ne.s32.totalorder %s1193_s20, %s1189_s19 }
   0x6   : > { %p23_p1 = scmp.eq.s32.totalorder %s22_s26, 0  ;;  %p33_p2 = scmp.eq.s32.totalorder %s1197_s21, 0 }
   0x7   : > { %p146_p3 = scmp.eq.s32.totalorder %s939_s22, 1  ;;  %p151_p4 = scmp.ne.s32.totalorder %s1189_s19, %s1185_s18 }
   0x8   : > { %s1271_s27 = scalar_select %p23_p1, %s1193_s20, %s25_s25  }
   0x9   : > { %p34_p5 = por %p33_p2, %p32_p0  ;;  %p1273_p6 = por %p146_p3, %p32_p0 }
   0xa   : > { %p152_p7 = scmp.eq.s32.totalorder %s940_s23, 1  ;;  %p942_p9 = scmp.ge.s32.totalorder %s1197_s21, 2 }
   0xc   : > { %p1277_p8 = por %p152_p7, %p151_p4  ;;  %180 = sbr.rel (%p942_p9) target bundleno = 26 (0x1a), region = 32 }
  0x13   : > { %183 = sbr.rel (!%p34_p5) target bundleno = 26 (0x1a), region = 36  ;;  %s185_s30 = sand.u32 (%p34_p5), 1, %s1193_s20  }
  0x14   : > { %s944_s6 = sshll.u32 (%p34_p5), %s1197_s21, 2  ;;  %s943_s7 = sshll.u32 (%p34_p5), %s185_s30, 4 }
  0x15   : > { %s189_s10 = scalar_lea.vmem (%p34_p5), %s1472_s0, %s944_s6  ;;  %s187_s11 = scalar_lea.vmem (%p34_p5), [#allocation2], %s943_s7 }
  0x16   : > { %v205_v0 = vld [vmem:[%s189_s10] sm:$0xf] (%p34_p5)  ;;  %v207_v1 = vld [vmem:[%s189_s10 + $0x8] sm:$0xf] (%p34_p5)  ;;  %v209_v2 = vld [vmem:[%s189_s10 + $0x10] sm:$0xf] (%p34_p5) }
  0x17   : > { %206 = vst [vmem:[%s187_s11] sm:$0xf] (%p34_p5), %v205_v0  ;;  %208 = vst [vmem:[%s187_s11 + $0x4] sm:$0xf] (%p34_p5), %v207_v1  ;;  %v211_v3 = vld [vmem:[%s189_s10 + $0x18] sm:$0xf] (%p34_p5) }
  0x18   : > { %210 = vst [vmem:[%s187_s11 + $0x8] sm:$0xf] (%p34_p5), %v209_v2  ;;  %212 = vst [vmem:[%s187_s11 + $0xc] sm:$0xf] (%p34_p5), %v211_v3 }
  0x1a PF: > { %p945_p10 = scmp.ge.s32.totalorder %s1197_s21, 1  ;;  %p242_p11 = scmp.lt.s32.totalorder %s1197_s21, 3 }
  0x1c   : > { %p243_p12 = pnand %p945_p10, %p242_p11 }
  0x1d   : > { %s1292_s12 = sand.u32 (!%p243_p12), 1, %s1189_s19   ;;  %v1117_v4 = vld [vmem:[%s1473_s1] sm:$0xff] (!%p243_p12)   ;;  %vm444_vm0 = vcmask (!%p243_p12), 244736   ;;  %vm469_vm1 = vcmask (!%p243_p12), 1046528   ;;  %v1199_v7 = vmov (!%p243_p12), 0   ;;  %v1118_v9 = vld [vmem:[%s1473_s1 + $0x8] sm:$0xff] (!%p243_p12)  }
  0x1e   : > { %246 = sbr.rel (%p243_p12) target bundleno = 814 (0x32e), region = 77  ;;  %s946_s13 = sshll.u32 (!%p243_p12), %s1292_s12, 4  ;;  %1008 = vmatprep.mubr.msk.bf16.mxu0 (!%p243_p12), %vm444_vm0, %v1117_v4  ;;  %1105 = vset.pattern.permute.xlu0 (!%p243_p12), %v1199_v7  ;;  %v1119_v10 = vld [vmem:[%s1473_s1 + $0x10] sm:$0xff] (!%p243_p12)   ;;  %v1308_v11 = vld [vmem:[%s1476_s4] sm:$0xff] (!%p243_p12)  ;;  %v1320_v13 = vld [vmem:[%s1476_s4 + $0x8] sm:$0xff] (!%p243_p12)  ;;  %v1200_v33 = vmov (!%p243_p12), 1  }
  0x1f   : > { %s251_s16 = scalar_lea.vmem (!%p243_p12), [#allocation2], %s946_s13  ;;  %1106 = vset.pattern.permute.xlu1 (!%p243_p12), %v1199_v7  ;;  %v1313_v12 = vld [vmem:[%s1476_s4 + $0x10] sm:$0xff] (!%p243_p12)  ;;  %315 = vperm.xlu0 (!%p243_p12), %1105, %v1308_v11   ;;  %v1325_v14 = vld [vmem:[%s1476_s4 + $0x18] sm:$0xff] (!%p243_p12)  ;;  %v280_v16 = vld [vmem:[%s1476_s4 + $0x20] sm:$0xff] (!%p243_p12)  ;;  %vm765_vm2 = vcmask (!%p243_p12), 523264   ;;  %s973_s17 = sshll.u32 (!%p243_p12), %s939_s22, 4 }
  0x20   : > { %v1115_v5 = vld [vmem:[%s251_s16] sm:$0xff] (!%p243_p12)   ;;  %v1116_v6 = vld [vmem:[%s251_s16 + $0x8] sm:$0x7f] (!%p243_p12)   ;;  %325 = vperm.xlu1 (!%p243_p12), %1106, %v1313_v12   ;;  %s274_s23 = scalar_lea.vmem (!%p243_p12), [#allocation3], %s1292_s12  ;;  %s1428_s6 = scalar_lea.hbm (!%p243_p12), %s1477_s5, %s973_s17 }
  0x21   : > { %1004 = vmatprep.subr.bf16.mxu0 (!%p243_p12), %v1115_v5  ;;  %v471_v8 = vsel (!%p243_p12), %vm469_vm1, %v1116_v6, 0  ;;  %v1120_v15 = vld [vmem:[%s1473_s1 + $0x18] sm:$0xff] (!%p243_p12)   ;;  %v281_v17 = vld [vmem:[%s1476_s4 + $0x28] sm:$0xff] (!%p243_p12)  ;;  %v1121_v18 = vld [vmem:[%s1473_s1 + $0x20] sm:$0xff] (!%p243_p12)   ;;  %s879_s25 = sshll.u32 (!%p243_p12), %s274_s23, 4  ;;  %s867_s7 = scalar_lea.sflag (!%p243_p12), [#allocation4], %s1292_s12  ;;  %s1430_s25 = int_to_ptr.vmem [resolvable:$true] %s879_s25 }
  0x22   : > { %1005 = vmatpush3.bf16.msra.mxu0 (!%p243_p12), %v1115_v5  ;;  %v282_v19 = vld [vmem:[%s1476_s4 + $0x30] sm:$0xff] (!%p243_p12)  ;;  %v283_v20 = vld [vmem:[%s1476_s4 + $0x38] sm:$0xff] (!%p243_p12)  ;;  %v284_v21 = vld [vmem:[%s1476_s4 + $0x40] sm:$0xff] (!%p243_p12)  ;;  %s1135_s8 = scalar_lea.vmem (!%p243_p12), %s1430_s25, 16  ;;  %s1204_s22 = smov (!%p243_p12), [#allocation3]  }
  0x23   : > { %1060 = vmatprep.subr.msk.bf16.mxu0 (!%p243_p12), %vm469_vm1, %v1116_v6  ;;  %320 = vperm.xlu0 (!%p243_p12), %1105, %v1320_v13   ;;  %v285_v22 = vld [vmem:[%s1476_s4 + $0x48] sm:$0xff] (!%p243_p12)  ;;  %v1123_v24 = vld [vmem:[%s1473_s1 + $0x30] sm:$0xff] (!%p243_p12)   ;;  %v287_v26 = vld [vmem:[%s1476_s4 + $0x58] sm:$0xff] (!%p243_p12)  ;;  %p1136_p13 = scmp.ne.s32.totalorder (!%p243_p12), %s1430_s25, %s1135_s8  ;;  %s1139_s9 = sshll.u32 (!%p243_p12), %s1204_s22, 4  ;;  %s1140_s9 = int_to_ptr.vmem [resolvable:$false] %s1139_s9 }
  0x24   : > { %330 = vperm.xlu1 (!%p243_p12), %1106, %v1325_v14   ;;  %v1122_v23 = vld [vmem:[%s1473_s1 + $0x28] sm:$0xff] (!%p243_p12)   ;;  %v286_v25 = vld [vmem:[%s1476_s4 + $0x50] sm:$0xff] (!%p243_p12)  ;;  %v288_v27 = vld [vmem:[%s1476_s4 + $0x60] sm:$0xff] (!%p243_p12)  ;;  %s1141_s10 = scalar_lea.vmem (!%p243_p12), %s1140_s9, 32  ;;  %p1142_p2 = scmp.lt.s32.totalorder (!%p243_p12), %s1430_s25, %s1140_s9 }
  0x25   : > { %v289_v28 = vld [vmem:[%s1476_s4 + $0x68] sm:$0xff]  ;;  %v1124_v29 = vld [vmem:[%s1473_s1 + $0x38] sm:$0xff]   ;;  %v290_v30 = vld [vmem:[%s1476_s4 + $0x70] sm:$0xff]  ;;  %p1137_p0 = pnand %p1136_p13, %p1273_p6  ;;  %p1143_p3 = scmp.lt.s32.totalorder %s1141_s10, %s1135_s8 }
  0x26   : > { %1007 = vmatpush3.bf16.msra.mxu0 %v471_v8  ;;  %v291_v31 = vld [vmem:[%s1476_s4 + $0x78] sm:$0xff]  ;;  %v1125_v32 = vld [vmem:[%s1474_s2] sm:$0xff]  }
  0x27   : > { %335 = vperm.xlu0 %1105, %v280_v16   ;;  %1040 = vmatprep.mubr.bf16.mxu1 %v1125_v32  ;;  %p1138_p1 = pneg %p1137_p0  ;;  %p1144_p4 = por %p1143_p3, %p1142_p2 }
  0x28   : > { %340 = vperm.xlu1 %1106, %v281_v17  }
  0x29   : > { %1009 = vmatmul.mubr.msk.bf16.vlgmr.msra.gmra.mrb[0].mxu0 %vm444_vm0, %v1118_v9  ;;  %p1145_p5 = pnand %p1144_p4, %p1138_p1 }
  0x2a   : > { %1012 = vmatprep.mubr.msk.bf16.mxu0 %vm444_vm0, %v1119_v10 }
  0x2b   : > { %345 = vperm.xlu0 %1105, %v282_v19  }
  0x2c   : > { %350 = vperm.xlu1 %1106, %v283_v20  }
  0x2f   : > { %355 = vperm.xlu0 %1105, %v284_v21  }
  0x30   : > { %360 = vperm.xlu1 %1106, %v285_v22  }
  0x31   : > { %1013 = vmatmul.mubr.msk.bf16.gmra.mrb[4].mxu0 %vm444_vm0, %v1120_v15 }
  0x32   : > { %1016 = vmatprep.mubr.msk.bf16.mxu0 %vm444_vm0, %v1121_v18 }
  0x33   : > { %365 = vperm.xlu0 %1105, %v286_v25  }
  0x34   : > { %370 = vperm.xlu1 %1106, %v287_v26  }
  0x37   : > { %375 = vperm.xlu0 %1105, %v288_v27  }
  0x38   : > { %380 = vperm.xlu1 %1106, %v289_v28  }
  0x39   : > { %1017 = vmatmul.mubr.msk.bf16.gmra.mrb[8].mxu0 %vm444_vm0, %v1122_v23 }
  0x3a   : > { %1020 = vmatprep.mubr.msk.bf16.mxu0 %vm444_vm0, %v1123_v24 }
  0x3b   : > { %385 = vperm.xlu0 %1105, %v290_v30  }
  0x3c   : > { %390 = vperm.xlu1 %1106, %v291_v31  }
  0x3f   : > { %1107 = vset.pattern.permute.xlu0 %v1200_v33 }
  0x40   : > { %1108 = vset.pattern.permute.xlu1 %v1200_v33  ;;  %603 = vperm.xlu0 %1107, %v1308_v11  }
  0x41   : > { %1021 = vmatmul.mubr.msk.bf16.gmra.mrb[12].mxu0 %vm444_vm0, %v1124_v29  ;;  %607 = vperm.xlu1 %1108, %v1320_v13  }
  0x44   : > { %615 = vperm.xlu0 %1107, %v1325_v14  }
  0x45   : > { %611 = vperm.xlu1 %1108, %v1313_v12  }
  0x48   : > { %623 = vperm.xlu0 %1107, %v281_v17  }
  0x49   : > { %619 = vperm.xlu1 %1108, %v280_v16  }
  0x4c   : > { %631 = vperm.xlu0 %1107, %v283_v20  }
  0x4d   : > { %627 = vperm.xlu1 %1108, %v282_v19  }
  0x9e   : > { %v316_v34 = vpop.permute.xlu0 %315 }
  0x9f   : > { %v326_v35 = vpop.permute.xlu1 %325 }
  0xa2   : > { %v321_v36 = vpop.permute.xlu0 %320 }
  0xa3   : > { %v331_v37 = vpop.permute.xlu1 %330 }
  0xa6   : > { %v336_v38 = vpop.permute.xlu0 %335 }
  0xa7   : > { %v341_v39 = vpop.permute.xlu1 %340 }
  0xaa   : > { %v346_v40 = vpop.permute.xlu0 %345 }
  0xab   : > { %v351_v44 = vpop.permute.xlu1 %350 }
  0xae   : > { %v356_v52 = vpop.permute.xlu0 %355 }
  0xaf   : > { %v361_v56 = vpop.permute.xlu1 %360 }
  0xb2   : > { %v366_v1 = vpop.permute.xlu0 %365 }
  0xb3   : > { %v371_v5 = vpop.permute.xlu1 %370 }
  0xb6   : > { %v376_v17 = vpop.permute.xlu0 %375 }
  0xb7   : > { %v381_v22 = vpop.permute.xlu1 %380 }
  0xba   : > { %v386_v29 = vpop.permute.xlu0 %385 }
  0xfc   : > { %v1010_v41 = vpop.f32.mrb[0].mxu0 }
  0xfd   : > { %v516_v42 = vadd.f32 %v1010_v41, %v326_v35  ;;  %v507_v43 = vpop.f32.mrb[1].mxu0 }
  0xfe   : > { %v508_v45 = vadd.f32 %v507_v43, %v316_v34  ;;  %v1011_v46 = vpop.f32.mrb[2].mxu0  ;;  %v391_v34 = vpop.permute.xlu1 %390 }
  0xff   : > { %v519_v47 = vadd.f32 %v1011_v46, %v331_v37  ;;  %v510_v48 = vpop.f32.mrb[3].mxu0  ;;  %v572_v50 = vmax.f32 %v516_v42, 0.0  ;;  %v1126_v46 = vld [vmem:[%s1474_s2 + $0x8] sm:$0xff]  }
 0x100   : > { %v511_v49 = vadd.f32 %v510_v48, %v321_v36  ;;  %v570_v53 = vmax.f32 %v508_v45, 0.0  ;;  %v1128_v48 = vld [vmem:[%s1474_s2 + $0x18] sm:$0xff]  }
 0x101   : > { %v573_v51 = vmax.f32 %v519_v47, 0.0  ;;  %v1127_v47 = vld [vmem:[%s1474_s2 + $0x10] sm:$0xff]  }
 0x102   : > { %v571_v54 = vmax.f32 %v511_v49, 0.0  ;;  %v1129_v49 = vld [vmem:[%s1475_s3] sm:$0xff]  }
 0x103   : > { %v595_v55 = vpack.c.bf16 %v573_v51, %v572_v50  ;;  %1056 = vmatprep.mubr.msk.bf16.mxu0 %vm765_vm2, %v1129_v49  ;;  %v1201_v50 = vmov 2   ;;  %v1202_v51 = vmov 4  }
 0x104   : > { %v1014_v57 = vpop.f32.mrb[4].mxu0  ;;  %v594_v58 = vpack.c.bf16 %v571_v54, %v570_v53  ;;  %1109 = vset.pattern.permute.xlu1 %v1201_v50  ;;  %1110 = vset.pattern.permute.xlu0 %v1201_v50  ;;  %v292_v53 = vld [vmem:[%s1476_s4] sm:$0x1]  ;;  %v608_v54 = vpop.permute.xlu1 %607 }
 0x105   : > { %v532_v59 = vadd.f32 %v1014_v57, %v346_v40  ;;  %v523_v60 = vpop.f32.mrb[5].mxu0  ;;  %740 = vperm.xlu1 %1109, %v1308_v11   ;;  %744 = vperm.xlu0 %1110, %v1320_v13  }
 0x106   : > { %v524_v61 = vadd.f32 %v523_v60, %v336_v38  ;;  %v1015_v62 = vpop.f32.mrb[6].mxu0  ;;  %1024 = vmatprep.subr.bf16.mxu1 %v594_v58 }
 0x107   : > { %v535_v63 = vadd.f32 %v1015_v62, %v351_v44  ;;  %v526_v0 = vpop.f32.mrb[7].mxu0  ;;  %1025 = vmatpush3.bf16.msra.mxu1 %v594_v58  ;;  %v576_v3 = vmax.f32 %v532_v59, 0.0 }
 0x108   : > { %v527_v2 = vadd.f32 %v526_v0, %v341_v39  ;;  %1026 = vmatprep.subr.bf16.mxu1 %v595_v55  ;;  %v574_v6 = vmax.f32 %v524_v61, 0.0 }
 0x109   : > { %v577_v4 = vmax.f32 %v535_v63, 0.0  ;;  %748 = vperm.xlu1 %1109, %v1313_v12   ;;  %1111 = vset.pattern.permute.xlu0 %v1202_v51 }
 0x10a   : > { %v575_v7 = vmax.f32 %v527_v2, 0.0  ;;  %826 = vperm.xlu0 %1111, %v1308_v11   ;;  %v612_v11 = vpop.permute.xlu1 %611 }
 0x10b   : > { %v597_v8 = vpack.c.bf16 %v577_v4, %v576_v3  ;;  %1027 = vmatpush3.bf16.msra.mxu1 %v595_v55  ;;  %v604_v55 = vpop.permute.xlu0 %603 }
 0x10c   : > { %v596_v9 = vpack.c.bf16 %v575_v7, %v574_v6  ;;  %v1018_v10 = vpop.f32.mrb[8].mxu0 }
 0x10d   : > { %v548_v15 = vadd.f32 %v1018_v10, %v366_v1  ;;  %v539_v16 = vpop.f32.mrb[9].mxu0  ;;  %752 = vperm.xlu1 %1109, %v1325_v14  }
 0x10e   : > { %v540_v18 = vadd.f32 %v539_v16, %v356_v52  ;;  %v1019_v19 = vpop.f32.mrb[10].mxu0  ;;  %1028 = vmatprep.subr.bf16.mxu1 %v596_v9  ;;  %838 = vperm.xlu0 %1111, %v1325_v14   ;;  %v1203_v52 = vmov 3   ;;  %v620_v59 = vpop.permute.xlu1 %619 }
 0x10f   : > { %v551_v20 = vadd.f32 %v1019_v19, %v371_v5  ;;  %v542_v21 = vpop.f32.mrb[11].mxu0  ;;  %1029 = vmatpush3.bf16.msra.mxu1 %v596_v9  ;;  %v580_v24 = vmax.f32 %v548_v15, 0.0 }
 0x110   : > { %v543_v23 = vadd.f32 %v542_v21, %v361_v56  ;;  %1030 = vmatprep.subr.bf16.mxu1 %v597_v8  ;;  %v578_v26 = vmax.f32 %v540_v18, 0.0  ;;  %v616_v56 = vpop.permute.xlu0 %615 }
 0x111   : > { %v581_v25 = vmax.f32 %v551_v20, 0.0  ;;  %1112 = vset.pattern.permute.xlu1 %v1202_v51 }
 0x112   : > { %v579_v27 = vmax.f32 %v543_v23, 0.0  ;;  %830 = vperm.xlu1 %1112, %v1320_v13   ;;  %1114 = vset.pattern.permute.xlu0 %v1203_v52  ;;  %v628_v5 = vpop.permute.xlu1 %627 }
 0x113   : > { %v599_v28 = vpack.c.bf16 %v581_v25, %v580_v24  ;;  %1031 = vmatpush3.bf16.msra.mxu1 %v597_v8 }
 0x114   : > { %v598_v30 = vpack.c.bf16 %v579_v27, %v578_v26  ;;  %v1022_v31 = vpop.f32.mrb[12].mxu0  ;;  %v624_v63 = vpop.permute.xlu0 %623  ;;  %v1130_v26 = vld [vmem:[%s1475_s3 + $0x8] sm:$0xff]  }
 0x115   : > { %v564_v32 = vadd.f32 %v1022_v31, %v386_v29  ;;  %v555_v33 = vpop.f32.mrb[13].mxu0 }
 0x116   : > { %v556_v35 = vadd.f32 %v555_v33, %v376_v17  ;;  %v1023_v36 = vpop.f32.mrb[14].mxu0  ;;  %1032 = vmatprep.subr.bf16.mxu1 %v598_v30  ;;  %834 = vperm.xlu1 %1112, %v1313_v12  }
 0x117   : > { %v567_v37 = vadd.f32 %v1023_v36, %v391_v34  ;;  %v558_v38 = vpop.f32.mrb[15].mxu0  ;;  %1033 = vmatpush3.bf16.msra.mxu1 %v598_v30  ;;  %v584_v40 = vmax.f32 %v564_v32, 0.0 }
 0x118   : > { %v559_v39 = vadd.f32 %v558_v38, %v381_v22  ;;  %1034 = vmatprep.subr.bf16.mxu1 %v599_v28  ;;  %v582_v42 = vmax.f32 %v556_v35, 0.0  ;;  %v632_v10 = vpop.permute.xlu0 %631 }
 0x119   : > { %v585_v41 = vmax.f32 %v567_v37, 0.0 }
 0x11a   : > { %v583_v43 = vmax.f32 %v559_v39, 0.0  ;;  %1113 = vset.pattern.permute.xlu1 %v1203_v52 }
 0x11b   : > { %v601_v44 = vpack.c.bf16 %v585_v41, %v584_v40  ;;  %1035 = vmatpush3.bf16.msra.mxu1 %v599_v28  ;;  %856 = vperm.xlu1 %1113, %v292_v53  }
 0x11c   : > { %v600_v45 = vpack.c.bf16 %v583_v43, %v582_v42 }
 0x11e   : > { %1036 = vmatprep.subr.bf16.mxu1 %v600_v45 }
 0x11f   : > { %1037 = vmatpush3.bf16.msra.mxu1 %v600_v45 }
 0x120   : > { %1038 = vmatprep.subr.bf16.mxu1 %v601_v44 }
 0x123   : > { %1039 = vmatpush3.bf16.msra.mxu1 %v601_v44 }
 0x126   : > { %1041 = vmatmul.mubr.bf16.vlgmr.msra.gmra.mrb[0].mxu1 %v1126_v46 }
 0x127   : > { %1044 = vmatprep.mubr.bf16.mxu1 %v1127_v47 }
 0x12e   : > { %1045 = vmatmul.mubr.bf16.gmra.mrb[4].mxu1 %v1128_v48 }
 0x184   : > { %v741_v27 = vpop.permute.xlu1 %740  ;;  %v745_v30 = vpop.permute.xlu0 %744 }
 0x188   : > { %v749_v28 = vpop.permute.xlu1 %748 }
 0x189   : > { %v827_v38 = vpop.permute.xlu0 %826 }
 0x18c   : > { %v753_v29 = vpop.permute.xlu1 %752 }
 0x18d   : > { %v839_v48 = vpop.permute.xlu0 %838 }
 0x191   : > { %v831_v33 = vpop.permute.xlu1 %830 }
 0x195   : > { %v835_v44 = vpop.permute.xlu1 %834 }
 0x1f9   : > { %v1042_v57 = vpop.f32.mrb[0].mxu1 }
 0x1fa   : > { %v701_v58 = vadd.f32 %v1042_v57, %v612_v11  ;;  %v692_v14 = vpop.f32.mrb[1].mxu1 }
 0x1fb   : > { %v693_v60 = vadd.f32 %v692_v14, %v604_v55  ;;  %v1043_v13 = vpop.f32.mrb[2].mxu1 }
 0x1fc   : > { %v704_v61 = vadd.f32 %v1043_v13, %v616_v56  ;;  %v695_v62 = vpop.f32.mrb[3].mxu1  ;;  %v725_v0 = vmax.f32 %v701_v58, 0.0  ;;  %v857_v58 = vpop.permute.xlu1 %856 }
 0x1fd   : > { %v696_v12 = vadd.f32 %v695_v62, %v608_v54  ;;  %v723_v2 = vmax.f32 %v693_v60, 0.0 }
 0x1fe   : > { %v726_v1 = vmax.f32 %v704_v61, 0.0 }
 0x1ff   : > { %v724_v3 = vmax.f32 %v696_v12, 0.0 }
 0x200   : > { %v736_v4 = vpack.c.bf16 %v726_v1, %v725_v0 }
 0x201   : > { %v735_v6 = vpack.c.bf16 %v724_v3, %v723_v2  ;;  %v1046_v7 = vpop.f32.mrb[4].mxu1 }
 0x202   : > { %v717_v8 = vadd.f32 %v1046_v7, %v628_v5  ;;  %v708_v9 = vpop.f32.mrb[5].mxu1 }
 0x203   : > { %v709_v15 = vadd.f32 %v708_v9, %v620_v59  ;;  %v1047_v16 = vpop.f32.mrb[6].mxu1  ;;  %1048 = vmatprep.subr.bf16.mxu0 %v735_v6 }
 0x204   : > { %v720_v17 = vadd.f32 %v1047_v16, %v632_v10  ;;  %v711_v18 = vpop.f32.mrb[7].mxu1  ;;  %1049 = vmatpush3.bf16.msra.mxu0 %v735_v6  ;;  %v729_v20 = vmax.f32 %v717_v8, 0.0 }
 0x205   : > { %v712_v19 = vadd.f32 %v711_v18, %v624_v63  ;;  %1050 = vmatprep.subr.bf16.mxu0 %v736_v4  ;;  %v727_v22 = vmax.f32 %v709_v15, 0.0 }
 0x206   : > { %v730_v21 = vmax.f32 %v720_v17, 0.0 }
 0x207   : > { %v728_v23 = vmax.f32 %v712_v19, 0.0 }
 0x208   : > { %v738_v24 = vpack.c.bf16 %v730_v21, %v729_v20  ;;  %1051 = vmatpush3.bf16.msra.mxu0 %v736_v4 }
 0x209   : > { %v737_v25 = vpack.c.bf16 %v728_v23, %v727_v22 }
 0x20b   : > { %1052 = vmatprep.subr.bf16.mxu0 %v737_v25 }
 0x20c   : > { %1053 = vmatpush3.bf16.msra.mxu0 %v737_v25 }
 0x20d   : > { %1054 = vmatprep.subr.bf16.mxu0 %v738_v24 }
 0x210   : > { %1055 = vmatpush3.bf16.msra.mxu0 %v738_v24 }
 0x213   : > { %1057 = vmatmul.mubr.msk.bf16.vlgmr.msra.gmra.mrb[16].mxu0 %vm765_vm2, %v1130_v26 }
 0x2e6   : > { %v1058_v31 = vpop.f32.mrb[16].mxu0 }
 0x2e7   : > { %v806_v32 = vpop.f32.mrb[17].mxu0  ;;  %v815_v34 = vadd.f32 %v1058_v31, %v749_v28 }
 0x2e8   : > { %v807_v35 = vadd.f32 %v806_v32, %v741_v27  ;;  %v1059_v36 = vpop.f32.mrb[18].mxu0 }
 0x2e9   : > { %v809_v37 = vpop.f32.mrb[19].mxu0  ;;  %v818_v40 = vadd.f32 %v1059_v36, %v753_v29  ;;  %v823_v42 = vmax.f32 %v815_v34, 0.0 }
 0x2ea   : > { %v821_v39 = vmax.f32 %v807_v35, 0.0  ;;  %v810_v41 = vadd.f32 %v809_v37, %v745_v30 }
 0x2eb   : > { %v824_v45 = vmax.f32 %v818_v40, 0.0  ;;  %v843_v50 = vmul.f32 %v835_v44, %v823_v42 }
 0x2ec   : > { %v822_v43 = vmax.f32 %v810_v41, 0.0  ;;  %v841_v47 = vmul.f32 %v827_v38, %v821_v39 }
 0x2ed   : > { %v844_v52 = vmul.f32 %v839_v48, %v824_v45 }
 0x2ee   : > { %v842_v46 = vmul.f32 %v831_v33, %v822_v43 }
 0x2f0   : > { %v845_v49 = vadd.f32 %v842_v46, %v841_v47 }
 0x2f2   : > { %v846_v51 = vadd.f32 %v845_v49, %v843_v50 }
 0x2f4   : > { %v847_v53 = vadd.f32 %v846_v51, %v844_v52 }
 0x2f6   : > { %v848_v54 = vrot.slane %v847_v53, 4 }
 0x2f8   : > { %v849_v55 = vadd.f32 %v848_v54, %v847_v53 }
 0x2fa   : > { %v850_v11 = vrot.slane %v849_v55, 2 }
 0x2fc   : > { %v851_v56 = vadd.f32 %v850_v11, %v849_v55 }
 0x2fe   : > { %v852_v57 = vrot.slane %v851_v56, 1 }
 0x300   : > { %v853_v14 = vadd.f32 %v852_v57, %v851_v56 }
 0x302   : > { %v859_v59 = vadd.f32 %v857_v58, %v853_v14 }
 0x304   : > { %v860_v60 = vsub.f32 0.0, %v859_v59 }
 0x306   : > { %v861_v13 = vmul.f32 1.442695, %v860_v60 }
 0x308   : > { %1131 = vpow2.f32 %v861_v13 }
 0x312   : > { %v1132_v61 = vpop.eup %1131 }
 0x313   : > { %v863_v62 = vadd.f32 1.0, %v1132_v61 }
 0x315   : > { %1133 = vrcp.f32 %v863_v62 }
 0x31f   : > { %v1134_v63 = vpop.eup %1133 }
 0x320   : > { %865 = vst [vmem:[%s274_s23] sm:$0x1] %v1134_v63 }
 0x321   : > { %1148 = shalt.err (!%p1145_p5)
}
 0x322   : > { %s1149_s12 = scalar_lea.hbm %s1428_s6, 16  ;;  %s1153_s14 = scalar_lea.hbm %s1477_s5, 32 }
 0x323   : > { %p1150_p7 = scmp.ne.s32.totalorder %s1428_s6, %s1149_s12  ;;  %p1154_p12 = scmp.lt.u32.totalorder %s1428_s6, %s1477_s5 }
 0x324   : > { %p1155_p13 = scmp.lt.u32.totalorder %s1153_s14, %s1149_s12  ;;  %p1157_p1 = scmp.lt.u32.totalorder %s1149_s12, %s1428_s6 }
 0x325   : > { %p1151_p10 = pnand %p1150_p7, %p1273_p6 }
 0x326   : > { %p1156_p0 = por %p1155_p13, %p1154_p12 }
 0x327   : > { %p1152_p11 = pneg %p1151_p10 }
 0x328   : > { %p1158_p2 = por %p1157_p1, %p1156_p0 }
 0x32a   : > { %p1159_p3 = pnand %p1158_p2, %p1152_p11 }
 0x32c   : > { %1162 = shalt.err (!%p1159_p3)
}
 0x32d   : > { %1061 = dma.vmem_to_hbm [thread:$0]  (%p1273_p6), %s1430_s25, 16, %s1428_s6, %s867_s7  }
 0x32e PF: > { %s891_s17 = sand.u32 1, %s1185_s18   ;;  %p1064_p4 = pnand %p942_p9, %p1277_p8 }
 0x32f   : > { %s892_s23 = scalar_lea.sflag [#allocation4], %s891_s17 }
 0x330   : > { %1180 = dma.done.wait (!%p1064_p4), %s892_s23, 16  }
 0x331   : > { %1182 = vsyncadd (!%p1064_p4), %s892_s23, 4294967280  ;;  %p15_p5 = scmp.ge.s32.totalorder %s1258_s24, 4   ;;  %s1480_s18 = smov %s1189_s19 }
 0x332   : > { %s1481_s19 = smov %s1193_s20  ;;  %s1482_s20 = smov %s1271_s27 }
 0x333   : > { %s1483_s21 = smov %s1258_s24  ;;  %17 = sbr.rel (!%p15_p5) target bundleno = 3 (0x3), region = 121 }
 0x33a   :  { %896 = vsyncpa [#allocation4], 1 }
 0x33b   :  { %898 = vsyncpa [#allocation4 + $0x1], 1 }

</bundles_post_ra>
